<compile_context>
chip_gen: v7x
topology: tpu7x:2x2x1
jax: 0.10.0
libtpu: 0.0.40
codegen_flags: <defaults>
</compile_context>

<pallas_src>
import jax
import jax.numpy as jnp
from jax.experimental import pallas as pl
from jax.experimental.pallas import tpu as pltpu


def _round_up(n: int, m: int) -> int:
    return ((n + m - 1) // m) * m


def _policy_mlp_kernel(obs_ref, w1_ref, b1_ref, w2_ref, b2_ref, w3_ref, b3_ref,
                       out_ref):
    """Fused 3-layer MLP forward for one batch tile.

    obs is loaded in its native layout and cast to bf16 in-register; weights
    are bf16, accumulation and biases are f32; each ReLU output is cast to
    bf16 once before feeding the next MXU pass.
    """
    x = obs_ref[...].astype(jnp.bfloat16)                      # (TB, Din) bf16

    h1 = jnp.dot(x, w1_ref[...], preferred_element_type=jnp.float32)
    h1 = jnp.maximum(h1 + b1_ref[...], 0.0).astype(jnp.bfloat16)   # ReLU -> bf16

    h2 = jnp.dot(h1, w2_ref[...], preferred_element_type=jnp.float32)
    h2 = jnp.maximum(h2 + b2_ref[...], 0.0).astype(jnp.bfloat16)   # ReLU -> bf16

    logits = jnp.dot(h2, w3_ref[...], preferred_element_type=jnp.float32)
    out_ref[...] = (logits + b3_ref[...]).astype(out_ref.dtype)


def policy_inference(obs, params, *, batch_tile: int = 1024):
    """Mirrors PolicyInferenceWrapper.forward: returns policy(obs, None)."""
    w1, b1, w2, b2, w3, b3 = params
    batch, obs_dim = obs.shape
    h1_dim = w1.shape[1]
    h2_dim = w2.shape[1]
    act_dim = w3.shape[1]

    # Fail loudly on inconsistent parameter stacks.
    assert w1.shape == (obs_dim, h1_dim), (w1.shape, (obs_dim, h1_dim))
    assert w2.shape == (h1_dim, h2_dim), (w2.shape, (h1_dim, h2_dim))
    assert w3.shape == (h2_dim, act_dim), (w3.shape, (h2_dim, act_dim))
    assert b1.shape == (1, h1_dim), b1.shape
    assert b2.shape == (1, h2_dim), b2.shape
    assert b3.shape == (1, act_dim), b3.shape

    # Batch tile: multiple of 16 (bf16 sublane packing), large by default to
    # amortize the ~0.35us per-grid-step overhead, and capped near batch/2 so
    # the grid has >= 2 steps whenever possible (double-buffer overlap; both
    # v7x TensorCores busy via "parallel" semantics).
    tb = min(batch_tile, max(16, _round_up(pl.cdiv(batch, 2), 16)))
    grid = (pl.cdiv(batch, tb),)   # ragged tail handled by Pallas OOB masking

    # Constant index_map -> block is DMA'd once and stays resident in VMEM.
    def resident(arr):
        return pl.BlockSpec(arr.shape, lambda i: (0,) * arr.ndim)

    cost = pl.CostEstimate(
        flops=2 * batch * (obs_dim * h1_dim + h1_dim * h2_dim + h2_dim * act_dim),
        transcendentals=0,
        bytes_accessed=(obs.size * obs.dtype.itemsize
                        + sum(p.size * p.dtype.itemsize for p in params)
                        + batch * act_dim * 4),
    )

    return pl.pallas_call(
        _policy_mlp_kernel,
        out_shape=jax.ShapeDtypeStruct((batch, act_dim), jnp.float32),
        grid_spec=pltpu.PrefetchScalarGridSpec(
            num_scalar_prefetch=0,
            grid=grid,
            in_specs=[
                pl.BlockSpec((tb, obs_dim), lambda i: (i, 0)),  # pipelined obs tile
                resident(w1), resident(b1),                     # weights stay in VMEM
                resident(w2), resident(b2),
                resident(w3), resident(b3),
            ],
            out_specs=pl.BlockSpec((tb, act_dim), lambda i: (i, 0)),
        ),
        compiler_params=pltpu.CompilerParams(
            dimension_semantics=("parallel",)),
        cost_estimate=cost,
    )(obs, w1, b1, w2, b2, w3, b3)


def init_policy_params(key, obs_dim, hidden, act_dim):
    """Deterministic synthetic parameter init (stand-in for a trained checkpoint)."""
    k1, k2, k3 = jax.random.split(key, 3)
    scale = 0.1
    w1 = (scale * jax.random.normal(k1, (obs_dim, hidden), jnp.float32)).astype(jnp.bfloat16)
    b1 = jnp.zeros((1, hidden), jnp.float32)
    w2 = (scale * jax.random.normal(k2, (hidden, hidden), jnp.float32)).astype(jnp.bfloat16)
    b2 = jnp.zeros((1, hidden), jnp.float32)
    w3 = (scale * jax.random.normal(k3, (hidden, act_dim), jnp.float32)).astype(jnp.bfloat16)
    b3 = jnp.zeros((1, act_dim), jnp.float32)
    return (w1, b1, w2, b2, w3, b3)


def _reference_forward(obs, params):
    """Pure-JAX reference of the same policy network (bf16 weights, f32 accum)."""
    w1, b1, w2, b2, w3, b3 = params
    x = obs.astype(jnp.bfloat16)
    h1 = jnp.maximum(
        jnp.dot(x, w1, preferred_element_type=jnp.float32) + b1, 0.0)
    h2 = jnp.maximum(
        jnp.dot(h1.astype(jnp.bfloat16), w2, preferred_element_type=jnp.float32) + b2, 0.0)
    return jnp.dot(h2.astype(jnp.bfloat16), w3, preferred_element_type=jnp.float32) + b3


if __name__ == "__main__":
    batch, obs_dim, hidden, act_dim = 8, 32, 64, 8

    key = jax.random.PRNGKey(0)
    k_obs, k_params, k_obs2 = jax.random.split(key, 3)

    params = init_policy_params(k_params, obs_dim, hidden, act_dim)

    # Small-batch case (single grid step, ragged tail rows masked on write).
    obs = jax.random.normal(k_obs, (batch, obs_dim), jnp.float32)
    out = jax.block_until_ready(policy_inference(obs, params))
    ref = _reference_forward(obs, params)
    assert out.shape == (batch, act_dim)
    assert jnp.allclose(out, ref, atol=2e-2, rtol=2e-2), "mismatch vs reference (small batch)"

    # Multi-step pipelined grid with a ragged final block.
    obs2 = jax.random.normal(k_obs2, (50, obs_dim), jnp.float32)
    out2 = jax.block_until_ready(policy_inference(obs2, params, batch_tile=32))
    ref2 = _reference_forward(obs2, params)
    assert out2.shape == (50, act_dim)
    assert jnp.allclose(out2, ref2, atol=2e-2, rtol=2e-2), "mismatch vs reference (ragged grid)"

    print("KERNEL_OK")
</pallas_src>

<mosaic_0001>
module attributes {stable_mosaic.version = 11 : i64} {
  func.func @_policy_mlp_kernel(%arg0: i32, %arg1: memref<16x32xf32, #tpu.memory_space<vmem>>, %arg2: memref<32x64xbf16, #tpu.memory_space<vmem>>, %arg3: memref<1x64xf32, #tpu.memory_space<vmem>>, %arg4: memref<64x64xbf16, #tpu.memory_space<vmem>>, %arg5: memref<1x64xf32, #tpu.memory_space<vmem>>, %arg6: memref<64x8xbf16, #tpu.memory_space<vmem>>, %arg7: memref<1x8xf32, #tpu.memory_space<vmem>>, %arg8: memref<16x8xf32, #tpu.memory_space<vmem>>) attributes {dimension_semantics = [#tpu.dimension_semantics<parallel>], iteration_bounds = array<i64: 1>, scalar_prefetch = 0 : i64, scratch_operands = 0 : i64, tpu.core_type = #tpu.core_type<tc>, window_params = [{transform_indices = @transform_0, window_bounds = array<i64: 16, 32>}, {pipeline_mode = #tpu.pipeline_mode<synchronous>, transform_indices = @transform_1, window_bounds = array<i64: 32, 64>}, {pipeline_mode = #tpu.pipeline_mode<synchronous>, transform_indices = @transform_2, window_bounds = array<i64: 1, 64>}, {pipeline_mode = #tpu.pipeline_mode<synchronous>, transform_indices = @transform_3, window_bounds = array<i64: 64, 64>}, {pipeline_mode = #tpu.pipeline_mode<synchronous>, transform_indices = @transform_4, window_bounds = array<i64: 1, 64>}, {pipeline_mode = #tpu.pipeline_mode<synchronous>, transform_indices = @transform_5, window_bounds = array<i64: 64, 8>}, {pipeline_mode = #tpu.pipeline_mode<synchronous>, transform_indices = @transform_6, window_bounds = array<i64: 1, 8>}, {transform_indices = @transform_7, window_bounds = array<i64: 16, 8>}]} {
    %c0 = arith.constant 0 : index
    %c0_0 = arith.constant 0 : index
    %0 = vector.load %arg1[%c0, %c0_0] : memref<16x32xf32, #tpu.memory_space<vmem>>, vector<16x32xf32>
    %1 = arith.truncf %0 : vector<16x32xf32> to vector<16x32xbf16>
    %c0_1 = arith.constant 0 : index
    %c0_2 = arith.constant 0 : index
    %2 = vector.load %arg2[%c0_1, %c0_2] : memref<32x64xbf16, #tpu.memory_space<vmem>>, vector<32x64xbf16>
    %cst = arith.constant dense<0.000000e+00> : vector<16x64xf32>
    %3 = tpu.matmul %1, %2, %cst {dimension_numbers = #tpu.dot_dimension_numbers<[1], [0], [0], [1], [0, 0, 1, 1], [], []>} : vector<16x32xbf16>, vector<32x64xbf16>, vector<16x64xf32> -> vector<16x64xf32>
    %c0_3 = arith.constant 0 : index
    %c0_4 = arith.constant 0 : index
    %4 = vector.load %arg3[%c0_3, %c0_4] : memref<1x64xf32, #tpu.memory_space<vmem>>, vector<1x64xf32>
    %5 = vector.broadcast %4 : vector<1x64xf32> to vector<16x64xf32>
    %6 = arith.addf %3, %5 : vector<16x64xf32>
    %cst_5 = arith.constant 0.000000e+00 : f32
    %7 = vector.broadcast %cst_5 : f32 to vector<16x64xf32>
    %8 = arith.maximumf %6, %7 : vector<16x64xf32>
    %9 = arith.truncf %8 : vector<16x64xf32> to vector<16x64xbf16>
    %c0_6 = arith.constant 0 : index
    %c0_7 = arith.constant 0 : index
    %10 = vector.load %arg4[%c0_6, %c0_7] : memref<64x64xbf16, #tpu.memory_space<vmem>>, vector<64x64xbf16>
    %cst_8 = arith.constant dense<0.000000e+00> : vector<16x64xf32>
    %11 = tpu.matmul %9, %10, %cst_8 {dimension_numbers = #tpu.dot_dimension_numbers<[1], [0], [0], [1], [0, 0, 1, 1], [], []>} : vector<16x64xbf16>, vector<64x64xbf16>, vector<16x64xf32> -> vector<16x64xf32>
    %c0_9 = arith.constant 0 : index
    %c0_10 = arith.constant 0 : index
    %12 = vector.load %arg5[%c0_9, %c0_10] : memref<1x64xf32, #tpu.memory_space<vmem>>, vector<1x64xf32>
    %13 = vector.broadcast %12 : vector<1x64xf32> to vector<16x64xf32>
    %14 = arith.addf %11, %13 : vector<16x64xf32>
    %cst_11 = arith.constant 0.000000e+00 : f32
    %15 = vector.broadcast %cst_11 : f32 to vector<16x64xf32>
    %16 = arith.maximumf %14, %15 : vector<16x64xf32>
    %17 = arith.truncf %16 : vector<16x64xf32> to vector<16x64xbf16>
    %c0_12 = arith.constant 0 : index
    %c0_13 = arith.constant 0 : index
    %18 = vector.load %arg6[%c0_12, %c0_13] : memref<64x8xbf16, #tpu.memory_space<vmem>>, vector<64x8xbf16>
    %cst_14 = arith.constant dense<0.000000e+00> : vector<16x8xf32>
    %19 = tpu.matmul %17, %18, %cst_14 {dimension_numbers = #tpu.dot_dimension_numbers<[1], [0], [0], [1], [0, 0, 1, 1], [], []>} : vector<16x64xbf16>, vector<64x8xbf16>, vector<16x8xf32> -> vector<16x8xf32>
    %c0_15 = arith.constant 0 : index
    %c0_16 = arith.constant 0 : index
    %20 = vector.load %arg7[%c0_15, %c0_16] : memref<1x8xf32, #tpu.memory_space<vmem>>, vector<1x8xf32>
    %21 = vector.broadcast %20 : vector<1x8xf32> to vector<16x8xf32>
    %22 = arith.addf %19, %21 : vector<16x8xf32>
    %c0_17 = arith.constant 0 : index
    %c0_18 = arith.constant 0 : index
    %23 = vector.load %arg8[%c0_17, %c0_18] : memref<16x8xf32, #tpu.memory_space<vmem>>, vector<16x8xf32>
    tpu.vector_store %arg8[%c0_17, %c0_18], %22 {strides = array<i32>} : memref<16x8xf32, #tpu.memory_space<vmem>>, vector<16x8xf32>,
    return
  }
  func.func @transform_0(%arg0: i32) -> (i32, i32) {
    %c0_i32 = arith.constant 0 : i32
    %c0_i32_0 = arith.constant 0 : i32
    return %arg0, %c0_i32 : i32, i32
  }
  func.func @transform_1(%arg0: i32) -> (i32, i32) {
    %c0_i32 = arith.constant 0 : i32
    %c0_i32_0 = arith.constant 0 : i32
    %c0_i32_1 = arith.constant 0 : i32
    return %c0_i32, %c0_i32_0 : i32, i32
  }
  func.func @transform_2(%arg0: i32) -> (i32, i32) {
    %c0_i32 = arith.constant 0 : i32
    %c0_i32_0 = arith.constant 0 : i32
    %c0_i32_1 = arith.constant 0 : i32
    return %c0_i32, %c0_i32_0 : i32, i32
  }
  func.func @transform_3(%arg0: i32) -> (i32, i32) {
    %c0_i32 = arith.constant 0 : i32
    %c0_i32_0 = arith.constant 0 : i32
    %c0_i32_1 = arith.constant 0 : i32
    return %c0_i32, %c0_i32_0 : i32, i32
  }
  func.func @transform_4(%arg0: i32) -> (i32, i32) {
    %c0_i32 = arith.constant 0 : i32
    %c0_i32_0 = arith.constant 0 : i32
    %c0_i32_1 = arith.constant 0 : i32
    return %c0_i32, %c0_i32_0 : i32, i32
  }
  func.func @transform_5(%arg0: i32) -> (i32, i32) {
    %c0_i32 = arith.constant 0 : i32
    %c0_i32_0 = arith.constant 0 : i32
    %c0_i32_1 = arith.constant 0 : i32
    return %c0_i32, %c0_i32_0 : i32, i32
  }
  func.func @transform_6(%arg0: i32) -> (i32, i32) {
    %c0_i32 = arith.constant 0 : i32
    %c0_i32_0 = arith.constant 0 : i32
    %c0_i32_1 = arith.constant 0 : i32
    return %c0_i32, %c0_i32_0 : i32, i32
  }
  func.func @transform_7(%arg0: i32) -> (i32, i32) {
    %c0_i32 = arith.constant 0 : i32
    %c0_i32_0 = arith.constant 0 : i32
    return %arg0, %c0_i32 : i32, i32
  }
}

</mosaic_0001>

<bundles_post_ra>
// kernel: tpu_custom_call.1
= control target key start
LH: loop header
LB: loop body
LE: loop exit
PB: predicated region body
PF: predicated region fallthrough
CT: control target
= control target key end

     0   :  { %12 = vsyncpa [#allocation3], 0  ;;  %s549_s0 = inlined_call_operand.vmem [shape: f32[8,32], index: 0, kind: input, shape index: {}]   ;;  %s550_s1 = inlined_call_operand.hbm [shape: bf16[32,64], index: 1, kind: input, shape index: {}]   ;;  %s551_s2 = inlined_call_operand.vmem [shape: f32[1,64], index: 2, kind: input, shape index: {}]   ;;  %s552_s3 = inlined_call_operand.vmem [shape: bf16[64,64], index: 3, kind: input, shape index: {}]   ;;  %s553_s4 = inlined_call_operand.vmem [shape: f32[1,64], index: 4, kind: input, shape index: {}]   ;;  %s554_s5 = inlined_call_operand.vmem [shape: bf16[64,8], index: 5, kind: input, shape index: {}]   ;;  %s555_s6 = inlined_call_operand.vmem [shape: f32[1,8], index: 6, kind: input, shape index: {}]   ;;  %s556_s7 = inlined_call_operand.hbm [shape: f32[8,8], index: 7, kind: output, shape index: {}]  }
   0x1   :  { %13 = vsyncpa [#allocation4], 0  ;;  %s433_s24 = smov [#allocation2]   ;;  %s385_s28 = scalar_lea.hbm %s550_s1, 256 }
   0x2   :  { %s21_s25 = sshll.u32 %s433_s24, 4  ;;  %p386_p0 = scmp.ne.s32.totalorder %s550_s1, %s385_s28  ;;  %s22_s25 = int_to_ptr.vmem [resolvable:$true] %s21_s25 }
   0x3   :  { %p389_p1 = scmp.lt.u32.totalorder %s385_s28, %s550_s1 }
   0x5   :  { %p391_p2 = pnand %p389_p1, %p386_p0 }
   0x7   :  { %394 = shalt.err (!%p391_p2)
}
   0x8   :  { %s395_s10 = scalar_lea.vmem %s22_s25, 256  ;;  %p400_p4 = scmp.lt.s32.totalorder %s22_s25, %s22_s25 }
   0x9   :  { %p396_p3 = scmp.ne.s32.totalorder %s22_s25, %s395_s10  ;;  %p401_p5 = scmp.lt.s32.totalorder %s395_s10, %s395_s10 }
   0xb   :  { %p402_p6 = por %p401_p5, %p400_p4 }
   0xd   :  { %p403_p7 = pnand %p402_p6, %p396_p3 }
   0xf   :  { %406 = shalt.err (!%p403_p7)
}
  0x10   :  { %s434_s11 = smov 64   ;;  %s435_s12 = smov 4  }
  0x11   :  { %27 = dma.hbm_to_vmem [thread:$0]  %s550_s1, 256, %s22_s25, [#allocation3], %s434_s11, %s434_s11, %s435_s12  }
  0x12   :  { %429 = dma.done.wait [#allocation3], 256  }
  0x13   :  { %430 = vsyncadd [#allocation3], 4294967040  ;;  %v436_v0 = vmov 0.0   ;;  %vm437_vm0 = vmmov 0   ;;  %v375_v1 = vld [vmem:[#allocation2] sm:$0xff]   ;;  %v376_v2 = vld [vmem:[#allocation2 + $0x8] sm:$0xff]  }
  0x14   :  { %335 = vmatprep.subr.bf16.mxu0 %v436_v0  ;;  %339 = vmatprep.mubr.msk.bf16.mxu0 %vm437_vm0, %v436_v0  ;;  %v42_v3 = vld [vmem:[%s549_s0] sm:$0xff]  ;;  %v43_v4 = vld [vmem:[%s549_s0 + $0x8] sm:$0xff]  ;;  %vm68_vm1 = vcmask 261120   ;;  %v379_v8 = vld [vmem:[%s552_s3 + $0x10] sm:$0xff]   ;;  %vm155_vm2 = vcmask 523264   ;;  %vm286_vm3 = vcmask 64512  }
  0x15   :  { %343 = vmatprep.subr.bf16.mxu1 %v436_v0  ;;  %351 = vmatprep.mubr.msk.bf16.mxu1 %vm437_vm0, %v436_v0  ;;  %v377_v5 = vld [vmem:[%s552_s3] sm:$0xff]   ;;  %v378_v6 = vld [vmem:[%s552_s3 + $0x8] sm:$0xff]   ;;  %v44_v7 = vpack.c.bf16 %v43_v4, %v42_v3  ;;  %v380_v9 = vld [vmem:[%s552_s3 + $0x18] sm:$0xff]  }
  0x16   :  { %336 = vmatpush3.bf16.msra.mxu0 %v375_v1  ;;  %344 = vmatpush3.bf16.msra.mxu1 %v377_v5  ;;  %v381_v10 = vld [vmem:[%s554_s5] sm:$0xff]   ;;  %v382_v11 = vld [vmem:[%s554_s5 + $0x8] sm:$0xff]   ;;  %v383_v22 = vld [vmem:[%s554_s5 + $0x10] sm:$0xff]  }
  0x17   :  { %337 = vmatprep.subr.bf16.mxu0 %v436_v0  ;;  %345 = vmatprep.subr.bf16.mxu1 %v436_v0  ;;  %v306_v12 = vld [vmem:[%s551_s2] ss:$0 sm:$0xff]  ;;  %v384_v23 = vld [vmem:[%s554_s5 + $0x18] sm:$0xff]  }
  0x18   :  { %v310_v24 = vld [vmem:[%s553_s4] ss:$0 sm:$0xff] }
  0x19   :  { %v316_v34 = vld [vmem:[%s555_s6] ss:$0 sm:$0xff] }
  0x1a   :  { %338 = vmatpush3.bf16.msra.mxu0 %v376_v2  ;;  %346 = vmatpush3.bf16.msra.mxu1 %v378_v6 }
  0x1b   :  { %355 = vmatprep.subr.bf16.mxu0 %v436_v0  ;;  %347 = vmatprep.subr.bf16.mxu1 %v436_v0 }
  0x1d   :  { %340 = vmatmul.mubr.msk.bf16.vlgmr.msra.gmra.mrb[0].mxu0 %vm68_vm1, %v44_v7 }
  0x1e   :  { %363 = vmatprep.mubr.msk.bf16.mxu0 %vm437_vm0, %v436_v0  ;;  %348 = vmatpush3.bf16.msra.mxu1 %v379_v8 }
  0x1f   :  { %349 = vmatprep.subr.bf16.mxu1 %v436_v0  ;;  %356 = vmatpush3.bf16.msra.mxu0 %v381_v10 }
  0x20   :  { %357 = vmatprep.subr.bf16.mxu0 %v436_v0 }
  0x22   :  { %350 = vmatpush3.bf16.msra.mxu1 %v380_v9 }
  0x23   :  { %358 = vmatpush3.bf16.msra.mxu0 %v382_v11 }
  0x24   :  { %359 = vmatprep.subr.bf16.mxu0 %v436_v0 }
  0x27   :  { %360 = vmatpush3.bf16.msra.mxu0 %v383_v22 }
  0x28   :  { %361 = vmatprep.subr.bf16.mxu0 %v436_v0 }
  0x2b   :  { %362 = vmatpush3.bf16.msra.mxu0 %v384_v23 }
  0xf0   :  { %v106_v13 = vpop.f32.mrb[0].mxu0 }
  0xf1   :  { %v107_v14 = vadd.f32 %v306_v12, %v106_v13  ;;  %v341_v15 = vpop.f32.mrb[1].mxu0 }
  0xf2   :  { %v109_v16 = vpop.f32.mrb[2].mxu0 }
  0xf3   :  { %v110_v17 = vadd.f32 %v306_v12, %v109_v16  ;;  %v342_v18 = vpop.f32.mrb[3].mxu0  ;;  %v113_v19 = vmax.f32 %v107_v14, 0.0 }
  0xf5   :  { %v114_v20 = vmax.f32 %v110_v17, 0.0 }
  0xf7   :  { %v115_v21 = vpack.c.bf16 %v114_v20, %v113_v19 }
  0xf9   :  { %352 = vmatmul.mubr.msk.bf16.vlgmr.msra.gmra.mrb[0].mxu1 %vm155_vm2, %v115_v21 }
 0x1cc   :  { %v193_v25 = vpop.f32.mrb[0].mxu1 }
 0x1cd   :  { %v194_v26 = vadd.f32 %v310_v24, %v193_v25  ;;  %v353_v27 = vpop.f32.mrb[1].mxu1 }
 0x1ce   :  { %v196_v28 = vpop.f32.mrb[2].mxu1 }
 0x1cf   :  { %v197_v29 = vadd.f32 %v310_v24, %v196_v28  ;;  %v354_v30 = vpop.f32.mrb[3].mxu1  ;;  %v200_v31 = vmax.f32 %v194_v26, 0.0 }
 0x1d1   :  { %v201_v32 = vmax.f32 %v197_v29, 0.0 }
 0x1d3   :  { %v202_v33 = vpack.c.bf16 %v201_v32, %v200_v31 }
 0x1d5   :  { %364 = vmatmul.mubr.msk.bf16.vlgmr.msra.gmra.mrb[4].mxu0 %vm155_vm2, %v202_v33 }
 0x2a8   :  { %v279_v35 = vpop.f32.mrb[4].mxu0 }
 0x2a9   :  { %v280_v36 = vadd.f32 %v316_v34, %v279_v35  ;;  %v365_v37 = vpop.f32.mrb[5].mxu0 }
 0x2aa   :  { %v282_v38 = vpop.f32.mrb[6].mxu0 }
 0x2ab   :  { %287 = vst.msk [vmem:[#allocation5] sm:$0xff] %vm286_vm3, %v280_v36  ;;  %v283_v39 = vadd.f32 %v316_v34, %v282_v38  ;;  %v366_v40 = vpop.f32.mrb[7].mxu0 }
 0x2ad   :  { %288 = vst.msk [vmem:[#allocation5 + $0x8] sm:$0xff] %vm286_vm3, %v283_v39 }
 0x2ae   :  { %293 = vsyncadd [#allocation4], 128  ;;  %s438_s4 = smov [#allocation5]  }
 0x2af   :  { %s294_s5 = sshll.u32 %s438_s4, 4  ;;  %s295_s5 = int_to_ptr.vmem [resolvable:$true] %s294_s5 }
 0x2b0   :  { %s407_s14 = scalar_lea.vmem %s295_s5, 128  ;;  %s411_s15 = scalar_lea.vmem %s295_s5, 256 }
 0x2b1   :  { %p408_p8 = scmp.ne.s32.totalorder %s295_s5, %s407_s14  ;;  %p412_p9 = scmp.lt.s32.totalorder %s295_s5, %s295_s5 }
 0x2b2   :  { %p413_p10 = scmp.lt.s32.totalorder %s411_s15, %s407_s14 }
 0x2b4   :  { %p414_p11 = por %p413_p10, %p412_p9 }
 0x2b6   :  { %p415_p12 = pnand %p414_p11, %p408_p8 }
 0x2b8   :  { %418 = shalt.err (!%p415_p12)
}
 0x2b9   :  { %s419_s17 = scalar_lea.hbm %s556_s7, 128 }
 0x2ba   :  { %p420_p13 = scmp.ne.s32.totalorder %s556_s7, %s419_s17  ;;  %p423_p0 = scmp.lt.u32.totalorder %s419_s17, %s556_s7 }
 0x2bc   :  { %p425_p1 = pnand %p423_p0, %p420_p13 }
 0x2be   :  { %428 = shalt.err (!%p425_p1)
}
 0x2bf   :  { %s439_s21 = smov 128   ;;  %s440_s0 = smov 8  }
 0x2c0   :  { %300 = dma.vmem_to_hbm [thread:$0]  %s295_s5, 128, %s556_s7, [#allocation4], %s439_s21, %s439_s21, %s440_s0  }
 0x2c1   :  { %431 = dma.done.wait [#allocation4], 256  }
 0x2c2   :  { %432 = vsyncadd [#allocation4], 4294967040 }
 0x2c3   :  { %304 = vsyncpa [#allocation3], 1 }
 0x2c4   :  { %305 = vsyncpa [#allocation4], 1 }

</bundles_post_ra>
